<compile_context>
chip_gen: v7x
topology: tpu7x:2x2x1
jax: 0.10.0
libtpu: 0.0.40
codegen_flags: <defaults>
</compile_context>

<pallas_src>
import math
from functools import partial

import jax
import jax.numpy as jnp
from jax.experimental import pallas as pl
from jax.experimental.pallas import tpu as pltpu

BN_EPS = 1e-5
_ROW_TILES = (1024, 512, 256, 128, 64, 32, 16, 8)


# ----------------------------------------------------------------------------
# small helpers
# ----------------------------------------------------------------------------

def _pick_tile(dim, candidates):
    """Largest candidate tile that divides `dim`, else the full extent
    (a block equal to the full array dim is always legal)."""
    for t in candidates:
        if dim % t == 0:
            return t
    return dim


def _apply_act(y, slope):
    # slope is a Python float (trace-time branch).
    if slope == 0.0:                       # ReLU
        return jnp.maximum(y, 0.0)
    if slope == 1.0:                       # identity
        return y
    return jnp.where(y >= 0.0, y, slope * y)   # LeakyReLU(slope)


# ----------------------------------------------------------------------------
# Pallas kernels
# ----------------------------------------------------------------------------

def _mm_bn_act_kernel(a_ref, b_ref, s_ref, t_ref, o_ref, *, slope):
    # bf16 MXU operands, f32 accumulation; BN + activation fused in the epilogue.
    a = a_ref[...].astype(jnp.bfloat16)
    acc = jnp.dot(a, b_ref[...], preferred_element_type=jnp.float32)
    y = acc * s_ref[...] + t_ref[...]
    o_ref[...] = _apply_act(y, slope)


def _mm_bn_add_relu_kernel(a_ref, b_ref, s_ref, t_ref, r_ref, o_ref):
    # matmul + BN + residual add + ReLU fused (eval-mode BasicBlock tail).
    a = a_ref[...].astype(jnp.bfloat16)
    acc = jnp.dot(a, b_ref[...], preferred_element_type=jnp.float32)
    o_ref[...] = jnp.maximum(acc * s_ref[...] + t_ref[...] + r_ref[...], 0.0)


def _bn_act_kernel(x_ref, s_ref, t_ref, o_ref, *, slope):
    o_ref[...] = _apply_act(x_ref[...] * s_ref[...] + t_ref[...], slope)


def _bn_act_res_kernel(x_ref, s_ref, t_ref, r_ref, o_ref):
    o_ref[...] = jnp.maximum(x_ref[...] * s_ref[...] + t_ref[...] + r_ref[...], 0.0)


def _parts_avgpool_kernel(x_ref, o_ref):
    o_ref[...] = jnp.mean(x_ref[...], axis=1)


def _dropout_kernel(x_ref, u_ref, o_ref, *, p):
    keep = u_ref[...] >= p
    o_ref[...] = jnp.where(keep, x_ref[...] * (1.0 / (1.0 - p)), 0.0)


def _l2norm_kernel(x_ref, o_ref):
    x = x_ref[...]
    n = jnp.sqrt(jnp.sum(x * x, axis=-1, keepdims=True))
    o_ref[...] = x / jnp.maximum(n, 1e-12)       # matches F.normalize eps


# ----------------------------------------------------------------------------
# Pallas wrappers
# ----------------------------------------------------------------------------

def matmul_bn_act(a, b_bf16, scale, shift, *, slope=1.0, residual=None,
                  tm=128, tn=128):
    """(M,K) @ (K,N) with BN scale/shift + activation (+ residual add + ReLU)
    fused into the matmul epilogue.  Full-K blocks: no K grid axis, no padding."""
    M, K = a.shape
    K2, N = b_bf16.shape
    assert K == K2
    tm = tm if M % tm == 0 else M          # full extent is always a legal block
    tn = tn if N % tn == 0 else N
    scale = scale.reshape(1, N).astype(jnp.float32)
    shift = shift.reshape(1, N).astype(jnp.float32)

    in_specs = [pl.BlockSpec((tm, K), lambda i, j: (i, 0)),
                pl.BlockSpec((K, tn), lambda i, j: (0, j)),
                pl.BlockSpec((1, tn), lambda i, j: (0, j)),
                pl.BlockSpec((1, tn), lambda i, j: (0, j))]
    args = [a, b_bf16, scale, shift]
    if residual is None:
        kernel = partial(_mm_bn_act_kernel, slope=float(slope))
    else:
        kernel = _mm_bn_add_relu_kernel
        in_specs.append(pl.BlockSpec((tm, tn), lambda i, j: (i, j)))
        args.append(residual.astype(jnp.float32))

    return pl.pallas_call(
        kernel,
        out_shape=jax.ShapeDtypeStruct((M, N), jnp.float32),
        grid=(M // tm, N // tn),
        in_specs=in_specs,
        out_specs=pl.BlockSpec((tm, tn), lambda i, j: (i, j)),
        compiler_params=pltpu.CompilerParams(
            dimension_semantics=("parallel", "parallel")),
    )(*args)


def bn_act_rows(y, scale, shift, *, slope=0.0, residual=None):
    """Tiled BN scale/shift + activation (+ residual add + ReLU) on (rows, C)."""
    M, C = y.shape
    bm = _pick_tile(M, _ROW_TILES)
    scale = scale.reshape(1, C).astype(jnp.float32)
    shift = shift.reshape(1, C).astype(jnp.float32)
    in_specs = [pl.BlockSpec((bm, C), lambda i: (i, 0)),
                pl.BlockSpec((1, C), lambda i: (0, 0)),
                pl.BlockSpec((1, C), lambda i: (0, 0))]
    args = [y, scale, shift]
    if residual is None:
        kernel = partial(_bn_act_kernel, slope=float(slope))
    else:
        kernel = _bn_act_res_kernel
        in_specs.append(pl.BlockSpec((bm, C), lambda i: (i, 0)))
        args.append(residual.astype(jnp.float32))
    return pl.pallas_call(
        kernel,
        out_shape=jax.ShapeDtypeStruct((M, C), jnp.float32),
        grid=(M // bm,),
        in_specs=in_specs,
        out_specs=pl.BlockSpec((bm, C), lambda i: (i, 0)),
        compiler_params=pltpu.CompilerParams(dimension_semantics=("parallel",)),
    )(*args)


def parts_avgpool(f_nhwc, parts):
    """AdaptiveAvgPool2d((parts, 1)) -> lane-dense (N*parts, C) rows."""
    N, H, W, C = f_nhwc.shape
    # TODO(synk): general AdaptiveAvgPool2d bin boundaries when H % parts != 0.
    assert H % parts == 0, "this kernel only handles H divisible by `parts`"
    strip = (H // parts) * W
    x = f_nhwc.reshape(N * parts, strip, C)
    R = N * parts
    bm = _pick_tile(R, _ROW_TILES)
    return pl.pallas_call(
        _parts_avgpool_kernel,
        out_shape=jax.ShapeDtypeStruct((R, C), jnp.float32),
        grid=(R // bm,),
        in_specs=[pl.BlockSpec((bm, strip, C), lambda i: (i, 0, 0))],
        out_specs=pl.BlockSpec((bm, C), lambda i: (i, 0)),
        compiler_params=pltpu.CompilerParams(dimension_semantics=("parallel",)),
    )(x)


def dropout_rows(x, key, p):
    p = float(p)
    if p <= 0.0:
        return x
    if p >= 1.0:                       # guard: avoids the p~1 edge case entirely
        return jnp.zeros_like(x)
    M, C = x.shape
    # Portable RNG (pltpu.prng_* is not available in interpret/CPU mode).
    u = jax.random.uniform(key, (M, C), jnp.float32)
    bm = _pick_tile(M, _ROW_TILES)
    return pl.pallas_call(
        partial(_dropout_kernel, p=p),
        out_shape=jax.ShapeDtypeStruct((M, C), jnp.float32),
        grid=(M // bm,),
        in_specs=[pl.BlockSpec((bm, C), lambda i: (i, 0)),
                  pl.BlockSpec((bm, C), lambda i: (i, 0))],
        out_specs=pl.BlockSpec((bm, C), lambda i: (i, 0)),
        compiler_params=pltpu.CompilerParams(dimension_semantics=("parallel",)),
    )(x, u)


def l2norm_rows(x):
    M, C = x.shape
    bm = _pick_tile(M, _ROW_TILES)
    return pl.pallas_call(
        _l2norm_kernel,
        out_shape=jax.ShapeDtypeStruct((M, C), jnp.float32),
        grid=(M // bm,),
        in_specs=[pl.BlockSpec((bm, C), lambda i: (i, 0))],
        out_specs=pl.BlockSpec((bm, C), lambda i: (i, 0)),
        compiler_params=pltpu.CompilerParams(dimension_semantics=("parallel",)),
    )(x)


# ----------------------------------------------------------------------------
# Glue (NHWC im2col, maxpool, layer composition) in plain JAX
# ----------------------------------------------------------------------------

def im2col_nhwc(x, kh, kw, stride, pad):
    """NHWC im2col -> (N*OH*OW, kh*kw*C) rows, tap-major / channel-minor K."""
    N, H, W, C = x.shape
    OH = (H + 2 * pad - kh) // stride + 1
    OW = (W + 2 * pad - kw) // stride + 1
    if kh == 1 and kw == 1 and pad == 0:
        rows = x[:, ::stride, ::stride, :].reshape(N * OH * OW, C)
        return rows, OH, OW
    xp = jnp.pad(x, ((0, 0), (pad, pad), (pad, pad), (0, 0)))
    cols = [xp[:, i:i + stride * OH:stride, j:j + stride * OW:stride, :]
            for i in range(kh) for j in range(kw)]
    patches = jnp.concatenate(cols, axis=-1)        # (N, OH, OW, kh*kw*C)
    return patches.reshape(N * OH * OW, kh * kw * C), OH, OW


def dense_bn_act(rows, layer, *, slope, training, residual_rows=None):
    """rows @ W  -> BN -> act (+ residual add + ReLU).  Eval: one fused pass.
    Training: fused matmul (identity epilogue) -> batch stats -> tiled BN pass."""
    w = layer['w']                                   # (K, Cout) bf16, pre-folded
    bn = layer['bn']
    cout = w.shape[1]
    if training:
        y = matmul_bn_act(rows, w,
                          jnp.ones((cout,), jnp.float32),
                          jnp.zeros((cout,), jnp.float32), slope=1.0)
        mean = jnp.mean(y, axis=0)
        var = jnp.var(y, axis=0)                     # biased, like torch BN fwd
        scale = bn['gamma'] / jnp.sqrt(var + BN_EPS)
        shift = bn['beta'] - mean * scale
        return bn_act_rows(y, scale, shift, slope=slope, residual=residual_rows)
    scale = bn['gamma'] / jnp.sqrt(bn['var'] + BN_EPS)
    shift = bn['beta'] - bn['mean'] * scale
    return matmul_bn_act(rows, w, scale, shift, slope=slope,
                         residual=residual_rows)


def conv_bn_act(x_nhwc, layer, *, stride, pad, slope, training,
                residual_rows=None):
    N = x_nhwc.shape[0]
    rows, OH, OW = im2col_nhwc(x_nhwc, layer['kh'], layer['kw'], stride, pad)
    y = dense_bn_act(rows, layer, slope=slope, training=training,
                     residual_rows=residual_rows)
    return y.reshape(N, OH, OW, layer['w'].shape[1])


def maxpool_3x3_s2_p1_nhwc(x):
    # Chained jnp.maximum over the 9 taps (single fused XLA pass; no 9x stack).
    N, H, W, C = x.shape
    OH = (H + 2 - 3) // 2 + 1
    OW = (W + 2 - 3) // 2 + 1
    xp = jnp.pad(x, ((0, 0), (1, 1), (1, 1), (0, 0)),
                 constant_values=-jnp.inf)
    out = None
    for i in range(3):
        for j in range(3):
            win = xp[:, i:i + 2 * OH:2, j:j + 2 * OW:2, :]
            out = win if out is None else jnp.maximum(out, win)
    return out


def basic_block_forward(x, bp, training):
    stride = bp['stride']
    out = conv_bn_act(x, bp['conv1'], stride=stride, pad=1, slope=0.0,
                      training=training)
    if 'downsample' in bp:
        idn = conv_bn_act(x, bp['downsample'], stride=stride, pad=0, slope=1.0,
                          training=training)
    else:
        idn = x
    N, OH, OW, C = out.shape
    idn_rows = idn.reshape(N * OH * OW, C)          # lane-dense (rows, channels)
    # conv2 + bn2 + residual add + relu fused into the same pass
    return conv_bn_act(out, bp['conv2'], stride=1, pad=1, slope=1.0,
                       training=training, residual_rows=idn_rows)


def featuremaps(params, x_nhwc, training):
    x = conv_bn_act(x_nhwc, params['conv1'], stride=2, pad=3, slope=0.0,
                    training=training)
    x = maxpool_3x3_s2_p1_nhwc(x)
    for layer in ('layer1', 'layer2', 'layer3', 'layer4'):
        for bp in params[layer]:
            x = basic_block_forward(x, bp, training)
    return x


def pcbt_forward(params, x_nchw, dropout_key, *, parts, training,
                 loss='softmax', dropout_p=0.5):
    x = jnp.transpose(x_nchw, (0, 2, 3, 1))          # NCHW -> NHWC once
    f = featuremaps(params, x, training)
    N, H, W, C = f.shape
    v_g = parts_avgpool(f, parts)                    # (N*parts, C) lane-dense

    if not training:
        v = l2norm_rows(v_g)
        # match PyTorch's (N, C, parts, 1).view(N, -1) channel-major ordering
        return v.reshape(N, parts, C).transpose(0, 2, 1).reshape(N, -1)

    v_g = dropout_rows(v_g, dropout_key, dropout_p)
    v_h = dense_bn_act(v_g, params['conv5'], slope=params['conv5']['slope'],
                       training=training)            # (N*parts, D)
    D = v_h.shape[1]
    vh = v_h.reshape(N, parts, D)
    # tiny per-part classifiers: plain einsum (10-wide outputs would waste the
    # MXU lanes and a pallas_call is pure launch overhead here).
    logits = jnp.einsum('npd,pcd->npc', vh, params['classifier']['w']) \
        + params['classifier']['b'][None]
    y = [logits[:, i, :] for i in range(parts)]

    if loss == 'softmax':
        return y
    elif loss == 'triplet':
        vg_n = l2norm_rows(v_g).reshape(N, parts, C).transpose(0, 2, 1)
        return y, vg_n.reshape(N, -1), vh.transpose(0, 2, 1).reshape(N, -1)
    else:
        raise KeyError('Unsupported loss: {}'.format(loss))


# ----------------------------------------------------------------------------
# Deterministic parameter initialization (matches PCBT._init_params)
# ----------------------------------------------------------------------------

def init_bn(c):
    return {'gamma': jnp.ones((c,), jnp.float32),
            'beta': jnp.zeros((c,), jnp.float32),
            'mean': jnp.zeros((c,), jnp.float32),
            'var': jnp.ones((c,), jnp.float32)}


def init_conv_layer(key, cout, cin, kh, kw):
    std = math.sqrt(2.0 / (cout * kh * kw))   # kaiming_normal_, fan_out, relu
    w = std * jax.random.normal(key, (cout, cin, kh, kw), jnp.float32)
    # fold once into im2col layout (K tap-major, channel-minor) and bf16-cast:
    wm = w.transpose(2, 3, 1, 0).reshape(kh * kw * cin, cout).astype(jnp.bfloat16)
    return {'w': wm, 'kh': kh, 'kw': kw, 'bn': init_bn(cout)}


def init_basic_block(key, inplanes, planes, stride):
    k1, k2, k3 = jax.random.split(key, 3)
    bp = {'conv1': init_conv_layer(k1, planes, inplanes, 3, 3),
          'conv2': init_conv_layer(k2, planes, planes, 3, 3),
          'stride': stride}
    if stride != 1 or inplanes != planes:     # BasicBlock expansion = 1
        bp['downsample'] = init_conv_layer(k3, planes, inplanes, 1, 1)
    return bp


def init_pcbt(key, num_classes, layers, parts=6, reduced_dim=256,
              nonlinear='relu'):
    keys = iter(jax.random.split(key, 64))
    params = {'conv1': init_conv_layer(next(keys), 64, 3, 7, 7)}
    inplanes = 64
    for name, planes, nblocks, stride in (('layer1', 64, layers[0], 1),
                                          ('layer2', 128, layers[1], 2),
                                          ('layer3', 256, layers[2], 2),
                                          ('layer4', 512, layers[3], 1)):
        blocks = [init_basic_block(next(keys), inplanes, planes, stride)]
        inplanes = planes
        for _ in range(1, nblocks):
            blocks.append(init_basic_block(next(keys), inplanes, planes, 1))
        params[name] = blocks
    slope = {'relu': 0.0, 'leakyrelu': 0.1}[nonlinear]
    conv5 = init_conv_layer(next(keys), reduced_dim, 512, 1, 1)
    conv5['slope'] = slope
    params['conv5'] = conv5
    params['classifier'] = {
        'w': 0.01 * jax.random.normal(next(keys),
                                      (parts, num_classes, reduced_dim),
                                      jnp.float32),
        'b': jnp.zeros((parts, num_classes), jnp.float32)}
    return params


# ----------------------------------------------------------------------------

if __name__ == "__main__":
    key = jax.random.PRNGKey(0)
    kp, kx, kd = jax.random.split(key, 3)

    num_classes = 10
    parts = 6
    layers = [1, 1, 1, 1]   # small BasicBlock backbone (expansion = 1)

    params = init_pcbt(kp, num_classes, layers, parts=parts, reduced_dim=256)
    x = jax.random.normal(kx, (2, 3, 96, 32), jnp.float32)   # NCHW like PyTorch

    # training forward (softmax loss): list of per-part logits
    y = pcbt_forward(params, x, kd, parts=parts, training=True, loss='softmax')
    y = [jax.block_until_ready(t) for t in y]
    assert len(y) == parts and all(t.shape == (2, num_classes) for t in y)

    # eval forward: L2-normalized pooled features, flattened like PyTorch
    feats = pcbt_forward(params, x, kd, parts=parts, training=False)
    feats = jax.block_until_ready(feats)
    assert feats.shape == (2, 512 * parts)

    print("KERNEL_OK")
</pallas_src>

<mosaic_0001>
module attributes {stable_mosaic.version = 11 : i64} {
  func.func @_mm_bn_act_kernel(%arg0: i32, %arg1: i32, %arg2: memref<128x147xf32, #tpu.memory_space<vmem>>, %arg3: memref<147x64xbf16, #tpu.memory_space<vmem>>, %arg4: memref<1x64xf32, #tpu.memory_space<vmem>>, %arg5: memref<1x64xf32, #tpu.memory_space<vmem>>, %arg6: memref<128x64xf32, #tpu.memory_space<vmem>>) attributes {dimension_semantics = [#tpu.dimension_semantics<parallel>, #tpu.dimension_semantics<parallel>], iteration_bounds = array<i64: 12, 1>, scalar_prefetch = 0 : i64, scratch_operands = 0 : i64, tpu.core_type = #tpu.core_type<tc>, window_params = [{transform_indices = @transform_0, window_bounds = array<i64: 128, 147>}, {transform_indices = @transform_1, window_bounds = array<i64: 147, 64>}, {transform_indices = @transform_2, window_bounds = array<i64: 1, 64>}, {transform_indices = @transform_3, window_bounds = array<i64: 1, 64>}, {transform_indices = @transform_4, window_bounds = array<i64: 128, 64>}]} {
    %c0 = arith.constant 0 : index
    %c0_0 = arith.constant 0 : index
    %0 = vector.load %arg2[%c0, %c0_0] : memref<128x147xf32, #tpu.memory_space<vmem>>, vector<128x147xf32>
    %1 = arith.truncf %0 : vector<128x147xf32> to vector<128x147xbf16>
    %c0_1 = arith.constant 0 : index
    %c0_2 = arith.constant 0 : index
    %2 = vector.load %arg3[%c0_1, %c0_2] : memref<147x64xbf16, #tpu.memory_space<vmem>>, vector<147x64xbf16>
    %cst = arith.constant dense<0.000000e+00> : vector<128x64xf32>
    %3 = tpu.matmul %1, %2, %cst {dimension_numbers = #tpu.dot_dimension_numbers<[1], [0], [0], [1], [0, 0, 1, 1], [], []>} : vector<128x147xbf16>, vector<147x64xbf16>, vector<128x64xf32> -> vector<128x64xf32>
    %c0_3 = arith.constant 0 : index
    %c0_4 = arith.constant 0 : index
    %4 = vector.load %arg4[%c0_3, %c0_4] : memref<1x64xf32, #tpu.memory_space<vmem>>, vector<1x64xf32>
    %5 = vector.broadcast %4 : vector<1x64xf32> to vector<128x64xf32>
    %6 = arith.mulf %3, %5 : vector<128x64xf32>
    %c0_5 = arith.constant 0 : index
    %c0_6 = arith.constant 0 : index
    %7 = vector.load %arg5[%c0_5, %c0_6] : memref<1x64xf32, #tpu.memory_space<vmem>>, vector<1x64xf32>
    %8 = vector.broadcast %7 : vector<1x64xf32> to vector<128x64xf32>
    %9 = arith.addf %6, %8 : vector<128x64xf32>
    %c0_7 = arith.constant 0 : index
    %c0_8 = arith.constant 0 : index
    %10 = vector.load %arg6[%c0_7, %c0_8] : memref<128x64xf32, #tpu.memory_space<vmem>>, vector<128x64xf32>
    tpu.vector_store %arg6[%c0_7, %c0_8], %9 {strides = array<i32>} : memref<128x64xf32, #tpu.memory_space<vmem>>, vector<128x64xf32>,
    return
  }
  func.func @transform_0(%arg0: i32, %arg1: i32) -> (i32, i32) {
    %c0_i32 = arith.constant 0 : i32
    %c0_i32_0 = arith.constant 0 : i32
    return %arg0, %c0_i32 : i32, i32
  }
  func.func @transform_1(%arg0: i32, %arg1: i32) -> (i32, i32) {
    %c0_i32 = arith.constant 0 : i32
    %c0_i32_0 = arith.constant 0 : i32
    return %c0_i32, %arg1 : i32, i32
  }
  func.func @transform_2(%arg0: i32, %arg1: i32) -> (i32, i32) {
    %c0_i32 = arith.constant 0 : i32
    %c0_i32_0 = arith.constant 0 : i32
    return %c0_i32, %arg1 : i32, i32
  }
  func.func @transform_3(%arg0: i32, %arg1: i32) -> (i32, i32) {
    %c0_i32 = arith.constant 0 : i32
    %c0_i32_0 = arith.constant 0 : i32
    return %c0_i32, %arg1 : i32, i32
  }
  func.func @transform_4(%arg0: i32, %arg1: i32) -> (i32, i32) {
    %c0_i32 = arith.constant 0 : i32
    return %arg0, %arg1 : i32, i32
  }
}

</mosaic_0001>

<bundles_post_ra>
// kernel: tpu_custom_call.1
= control target key start
LH: loop header
LB: loop body
LE: loop exit
PB: predicated region body
PF: predicated region fallthrough
CT: control target
= control target key end

     0   :  { %s843_s15 = smov 0   ;;  %s845_s16 = smov 0   ;;  %s1048_s0 = inlined_call_operand.vmem [shape: f32[1536,147], index: 0, kind: input, shape index: {}]   ;;  %s1049_s1 = inlined_call_operand.vmem [shape: bf16[147,64], index: 1, kind: input, shape index: {}]   ;;  %s1050_s2 = inlined_call_operand.vmem [shape: f32[1,64], index: 2, kind: input, shape index: {}]   ;;  %s1051_s3 = inlined_call_operand.vmem [shape: f32[1,64], index: 3, kind: input, shape index: {}]   ;;  %s1052_s4 = inlined_call_operand.vmem [shape: f32[1536,64], index: 4, kind: output, shape index: {}]  }
   0x1   :  { %s847_s17 = smov 0  }
   0x2 LB: > { %s26_s18 = sadd.s32 1, %s810_s16  ;;  %p707_p0 = scmp.ge.s32.totalorder %s814_s17, 1  ;;  %s814_s17 = sphi %s847_s17, %s14_s17   ;;  %s810_s16 = sphi %s845_s16, %s1054_s16   ;;  %s806_s15 = sphi %s843_s15, %s1053_s15  }
   0x3   : > { %p28_p1 = scmp.ge.s32.totalorder %s26_s18, 12  ;;  %p203_p2 = scmp.lt.s32.totalorder %s814_s17, 13 }
   0x5   : > { %s1056_s18 = smov (%p28_p1, %s26_s18), 0  ;;  %p204_p3 = pnand %p707_p0, %p203_p2 }
   0x6   : > { %v782_v0 = vld [vmem:[%s1049_s1] sm:$0xff] (!%p204_p3)   ;;  %v816_v1 = vmov (!%p204_p3), 0   ;;  %v783_v2 = vld [vmem:[%s1049_s1 + $0x8] sm:$0xff] (!%p204_p3)   ;;  %v784_v3 = vld [vmem:[%s1049_s1 + $0x10] sm:$0xff] (!%p204_p3)   ;;  %s708_s25 = sshll.u32 (!%p204_p3), %s806_s15, 4  ;;  %vm394_vm0 = vcmask (!%p204_p3), 154624  }
   0x7   : > { %207 = sbr.rel (%p204_p3) target bundleno = 290 (0x122), region = 36  ;;  %426 = vmatprep.subr.bf16.mxu0 (!%p204_p3), %v816_v1  ;;  %736 = vmatprep.subr.bf16.mxu1 (!%p204_p3), %v816_v1  ;;  %p244_p4 = scmp.lt.s32.totalorder (!%p204_p3), %s708_s25, 191  ;;  %v785_v4 = vld [vmem:[%s1049_s1 + $0x18] sm:$0xff] (!%p204_p3)   ;;  %v786_v8 = vld [vmem:[%s1049_s1 + $0x20] sm:$0xff] (!%p204_p3)   ;;  %v787_v12 = vld [vmem:[%s1049_s1 + $0x28] sm:$0xff] (!%p204_p3)   ;;  %vm419_vm1 = vcmask (!%p204_p3), 1040384  }
   0x8   : > { %427 = vmatpush1.bf16.msra.mxu0 (!%p204_p3), %v782_v0  ;;  %746 = vmatpush1.bf16.msra.mxu1 (!%p204_p3), %v782_v0  ;;  %v788_v13 = vld [vmem:[%s1049_s1 + $0x30] sm:$0xff] (!%p204_p3)   ;;  %v789_v14 = vld [vmem:[%s1049_s1 + $0x38] sm:$0xff] (!%p204_p3)   ;;  %vm420_vm2 = vcmask (!%p204_p3), 1041408   ;;  %v817_v15 = vmov (!%p204_p3), 65535   ;;  %v790_v17 = vld [vmem:[%s1049_s1 + $0x40] sm:$0xff] (!%p204_p3)   ;;  %vm569_vm3 = vcmask (!%p204_p3), 523264  }
   0x9   : > { %428 = vmatprep.subr.bf16.mxu0 (!%p204_p3), %v816_v1  ;;  %737 = vmatprep.subr.bf16.mxu1 (!%p204_p3), %v816_v1  ;;  %v421_v16 = vsel (!%p204_p3), %vm419_vm1, 4294967295, %v817_v15  ;;  %v791_v18 = vld [vmem:[%s1049_s1 + $0x48] ss:$0 sps:$4 sm:$0x33] (!%p204_p3)   ;;  %v962_v63 = vld [vmem:[%s1050_s2] ss:$0 sm:$0xff] (!%p204_p3) }
   0xa   : > { %v422_v19 = vsel (!%p204_p3), %vm420_vm2, %v421_v16, 0 }
   0xb   : > { %v424_v22 = vand.u32 (!%p204_p3), %v791_v18, %v422_v19 }
   0xc   : > { %429 = vmatpush1.bf16.msra.mxu0 (!%p204_p3), %v783_v2  ;;  %747 = vmatpush1.bf16.msra.mxu1 (!%p204_p3), %v783_v2 }
   0xd   : > { %430 = vmatprep.subr.bf16.mxu0 (!%p204_p3), %v816_v1  ;;  %738 = vmatprep.subr.bf16.mxu1 (!%p204_p3), %v816_v1 }
   0xe   : > { %s1058_s25 = smov (!%p244_p4, %s708_s25), 191 }
   0xf   : > { %s735_s28 = sshll.u32 %s1058_s25, 4  ;;  %s712_s23 = sshll.u32 %s1058_s25, 3 }
  0x10   : > { %431 = vmatpush1.bf16.msra.mxu0 %v784_v3  ;;  %748 = vmatpush1.bf16.msra.mxu1 %v784_v3  ;;  %s887_s5 = scalar_lea.vmem %s1048_s0, %s735_s28  ;;  %s975_s29 = scalar_lea.vmem %s1052_s4, %s712_s23 }
  0x11   : > { %432 = vmatprep.subr.bf16.mxu0 %v816_v1  ;;  %739 = vmatprep.subr.bf16.mxu1 %v816_v1  ;;  %v271_v5 = vld [vmem:[%s887_s5 + $0x8] sm:$0xff]  ;;  %v273_v6 = vld [vmem:[%s887_s5 + $0x18] sm:$0xff]  ;;  %v270_v20 = vld [vmem:[%s887_s5] sm:$0xff] }
  0x12   : > { %v287_v7 = vld [vmem:[%s887_s5 + $0x88] sm:$0xff]  ;;  %v303_v9 = vpack.c.bf16 %v273_v6, %v271_v5  ;;  %v289_v10 = vld [vmem:[%s887_s5 + $0x98] sm:$0xff]  ;;  %v272_v21 = vld [vmem:[%s887_s5 + $0x10] sm:$0xff] }
  0x13   : > { %v311_v11 = vpack.c.bf16 %v289_v10, %v287_v7  ;;  %v286_v23 = vld [vmem:[%s887_s5 + $0x80] sm:$0xff]  ;;  %v288_v24 = vld [vmem:[%s887_s5 + $0x90] sm:$0xff]  ;;  %v275_v25 = vld [vmem:[%s887_s5 + $0x28] sm:$0xff]  ;;  %v302_v29 = vpack.c.bf16 %v272_v21, %v270_v20 }
  0x14   : > { %433 = vmatpush1.bf16.msra.mxu0 %v785_v4  ;;  %749 = vmatpush1.bf16.msra.mxu1 %v785_v4  ;;  %v277_v26 = vld [vmem:[%s887_s5 + $0x38] sm:$0xff]  ;;  %v291_v27 = vld [vmem:[%s887_s5 + $0xa8] sm:$0xff]  ;;  %v310_v30 = vpack.c.bf16 %v288_v24, %v286_v23  ;;  %v274_v33 = vld [vmem:[%s887_s5 + $0x20] sm:$0xff] }
  0x15   : > { %434 = vmatprep.subr.bf16.mxu0 %v816_v1  ;;  %740 = vmatprep.subr.bf16.mxu1 %v816_v1  ;;  %v293_v28 = vld [vmem:[%s887_s5 + $0xb8] sm:$0xff]  ;;  %v305_v31 = vpack.c.bf16 %v277_v26, %v275_v25  ;;  %v276_v34 = vld [vmem:[%s887_s5 + $0x30] sm:$0xff]  ;;  %v290_v35 = vld [vmem:[%s887_s5 + $0xa0] sm:$0xff] }
  0x16   : > { %723 = vmatprep.mubr.msk.bf16.mxu0 %vm394_vm0, %v303_v9  ;;  %727 = vmatprep.mubr.msk.bf16.mxu1 %vm394_vm0, %v311_v11  ;;  %v313_v32 = vpack.c.bf16 %v293_v28, %v291_v27  ;;  %v292_v36 = vld [vmem:[%s887_s5 + $0xb0] sm:$0xff]  ;;  %v279_v37 = vld [vmem:[%s887_s5 + $0x48] sm:$0xff]  ;;  %v281_v38 = vld [vmem:[%s887_s5 + $0x58] sm:$0xff]  ;;  %v304_v41 = vpack.c.bf16 %v276_v34, %v274_v33 }
  0x17   : > { %v295_v39 = vld [vmem:[%s887_s5 + $0xc8] sm:$0xff]  ;;  %v297_v40 = vld [vmem:[%s887_s5 + $0xd8] sm:$0xff]  ;;  %v312_v42 = vpack.c.bf16 %v292_v36, %v290_v35  ;;  %v307_v43 = vpack.c.bf16 %v281_v38, %v279_v37  ;;  %v278_v45 = vld [vmem:[%s887_s5 + $0x40] sm:$0xff] }
  0x18   : > { %435 = vmatpush1.bf16.msra.mxu0 %v786_v8  ;;  %750 = vmatpush1.bf16.msra.mxu1 %v786_v8  ;;  %v315_v44 = vpack.c.bf16 %v297_v40, %v295_v39  ;;  %v280_v46 = vld [vmem:[%s887_s5 + $0x50] sm:$0xff]  ;;  %v294_v47 = vld [vmem:[%s887_s5 + $0xc0] sm:$0xff]  ;;  %v283_v49 = vld [vmem:[%s887_s5 + $0x68] sm:$0xff] }
  0x19   : > { %436 = vmatprep.subr.bf16.mxu0 %v816_v1  ;;  %741 = vmatprep.subr.bf16.mxu1 %v816_v1  ;;  %v296_v48 = vld [vmem:[%s887_s5 + $0xd0] sm:$0xff]  ;;  %v285_v50 = vld [vmem:[%s887_s5 + $0x78] sm:$0xff]  ;;  %v299_v51 = vld [vmem:[%s887_s5 + $0xe8] sm:$0xff]  ;;  %v306_v53 = vpack.c.bf16 %v280_v46, %v278_v45 }
  0x1a   : > { %v301_v52 = vld [vmem:[%s887_s5 + $0xf8] sm:$0xff]  ;;  %v314_v54 = vpack.c.bf16 %v296_v48, %v294_v47  ;;  %v309_v55 = vpack.c.bf16 %v285_v50, %v283_v49  ;;  %v282_v57 = vld [vmem:[%s887_s5 + $0x60] sm:$0xff]  ;;  %v284_v58 = vld [vmem:[%s887_s5 + $0x70] sm:$0xff] }
  0x1b   : > { %v317_v56 = vpack.c.bf16 %v301_v52, %v299_v51  ;;  %v298_v59 = vld [vmem:[%s887_s5 + $0xe0] sm:$0xff]  ;;  %v300_v60 = vld [vmem:[%s887_s5 + $0xf0] sm:$0xff]  ;;  %v308_v61 = vpack.c.bf16 %v284_v58, %v282_v57 }
  0x1c   : > { %437 = vmatpush1.bf16.msra.mxu0 %v787_v12  ;;  %751 = vmatpush1.bf16.msra.mxu1 %v787_v12  ;;  %v316_v62 = vpack.c.bf16 %v300_v60, %v298_v59 }
  0x1d   : > { %438 = vmatprep.subr.bf16.mxu0 %v816_v1  ;;  %742 = vmatprep.subr.bf16.mxu1 %v816_v1 }
  0x20   : > { %439 = vmatpush1.bf16.msra.mxu0 %v788_v13  ;;  %752 = vmatpush1.bf16.msra.mxu1 %v788_v13 }
  0x21   : > { %440 = vmatprep.subr.bf16.mxu0 %v816_v1  ;;  %743 = vmatprep.subr.bf16.mxu1 %v816_v1 }
  0x24   : > { %441 = vmatpush1.bf16.msra.mxu0 %v789_v14  ;;  %753 = vmatpush1.bf16.msra.mxu1 %v789_v14 }
  0x25   : > { %442 = vmatprep.subr.bf16.mxu0 %v816_v1  ;;  %744 = vmatprep.subr.bf16.mxu1 %v816_v1 }
  0x28   : > { %443 = vmatpush1.bf16.msra.mxu0 %v790_v17  ;;  %754 = vmatpush1.bf16.msra.mxu1 %v790_v17 }
  0x29   : > { %444 = vmatprep.subr.bf16.mxu0 %v816_v1  ;;  %745 = vmatprep.subr.bf16.mxu1 %v816_v1  ;;  %v968_v1 = vld [vmem:[%s1051_s3] ss:$0 sm:$0xff] }
  0x2c   : > { %445 = vmatpush1.bf16.msra.mxu0 %v424_v22  ;;  %755 = vmatpush1.bf16.msra.mxu1 %v424_v22 }
  0x2f   : > { %459 = vmatmul.mubr.bf16.vlgmr.msra.gmra.mrb[0].mxu0 %v302_v29  ;;  %491 = vmatmul.mubr.bf16.vlgmr.msra.gmra.mrb[0].mxu1 %v310_v30 }
  0x30   : > { %724 = vmatprep.mubr.msk.bf16.mxu0 %vm394_vm0, %v305_v31  ;;  %728 = vmatprep.mubr.msk.bf16.mxu1 %vm394_vm0, %v313_v32 }
  0x37   : > { %467 = vmatmul.mubr.bf16.gmra.mrb[4].mxu0 %v304_v41  ;;  %499 = vmatmul.mubr.bf16.gmra.mrb[4].mxu1 %v312_v42 }
  0x38   : > { %725 = vmatprep.mubr.msk.bf16.mxu0 %vm394_vm0, %v307_v43  ;;  %729 = vmatprep.mubr.msk.bf16.mxu1 %vm394_vm0, %v315_v44 }
  0x3f   : > { %475 = vmatmul.mubr.bf16.gmra.mrb[8].mxu0 %v306_v53  ;;  %507 = vmatmul.mubr.bf16.gmra.mrb[8].mxu1 %v314_v54 }
  0x40   : > { %726 = vmatprep.mubr.msk.bf16.mxu0 %vm394_vm0, %v309_v55  ;;  %730 = vmatprep.mubr.msk.bf16.mxu1 %vm394_vm0, %v317_v56 }
  0x47   : > { %483 = vmatmul.mubr.bf16.gmra.mrb[12].mxu0 %v308_v61  ;;  %515 = vmatmul.mubr.bf16.gmra.mrb[12].mxu1 %v316_v62 }
 0x102   : > { %v460_v0 = vpop.f32.mrb[0].mxu0  ;;  %v492_v2 = vpop.f32.mrb[0].mxu1 }
 0x103   : > { %v530_v3 = vmul.f32 %v962_v63, %v460_v0  ;;  %v538_v4 = vmul.f32 %v962_v63, %v492_v2  ;;  %v462_v5 = vpop.f32.mrb[1].mxu0  ;;  %v494_v6 = vpop.f32.mrb[1].mxu1 }
 0x104   : > { %v463_v7 = vpop.f32.mrb[2].mxu0  ;;  %v495_v8 = vpop.f32.mrb[2].mxu1 }
 0x105   : > { %v553_v9 = vadd.f32 %v968_v1, %v530_v3  ;;  %v561_v10 = vadd.f32 %v968_v1, %v538_v4  ;;  %v531_v11 = vmul.f32 %v962_v63, %v463_v7  ;;  %v539_v12 = vmul.f32 %v962_v63, %v495_v8  ;;  %v465_v13 = vpop.f32.mrb[3].mxu0  ;;  %v497_v14 = vpop.f32.mrb[3].mxu1 }
 0x107   : > { %570 = vst.msk [vmem:[%s975_s29] sm:$0xff] %vm569_vm3, %v553_v9  ;;  %578 = vst.msk [vmem:[%s975_s29 + $0x40] sm:$0xff] %vm569_vm3, %v561_v10  ;;  %v554_v15 = vadd.f32 %v968_v1, %v531_v11  ;;  %v562_v16 = vadd.f32 %v968_v1, %v539_v12 }
 0x109   : > { %571 = vst.msk [vmem:[%s975_s29 + $0x8] sm:$0xff] %vm569_vm3, %v554_v15  ;;  %579 = vst.msk [vmem:[%s975_s29 + $0x48] sm:$0xff] %vm569_vm3, %v562_v16 }
 0x10a   : > { %v468_v17 = vpop.f32.mrb[4].mxu0  ;;  %v500_v18 = vpop.f32.mrb[4].mxu1 }
 0x10b   : > { %v532_v19 = vmul.f32 %v962_v63, %v468_v17  ;;  %v540_v20 = vmul.f32 %v962_v63, %v500_v18  ;;  %v470_v21 = vpop.f32.mrb[5].mxu0  ;;  %v502_v22 = vpop.f32.mrb[5].mxu1 }
 0x10c   : > { %v471_v23 = vpop.f32.mrb[6].mxu0  ;;  %v503_v24 = vpop.f32.mrb[6].mxu1 }
 0x10d   : > { %v555_v25 = vadd.f32 %v968_v1, %v532_v19  ;;  %v563_v26 = vadd.f32 %v968_v1, %v540_v20  ;;  %v533_v27 = vmul.f32 %v962_v63, %v471_v23  ;;  %v541_v28 = vmul.f32 %v962_v63, %v503_v24  ;;  %v473_v29 = vpop.f32.mrb[7].mxu0  ;;  %v505_v30 = vpop.f32.mrb[7].mxu1 }
 0x10f   : > { %572 = vst.msk [vmem:[%s975_s29 + $0x10] sm:$0xff] %vm569_vm3, %v555_v25  ;;  %580 = vst.msk [vmem:[%s975_s29 + $0x50] sm:$0xff] %vm569_vm3, %v563_v26  ;;  %v556_v31 = vadd.f32 %v968_v1, %v533_v27  ;;  %v564_v32 = vadd.f32 %v968_v1, %v541_v28 }
 0x111   : > { %573 = vst.msk [vmem:[%s975_s29 + $0x18] sm:$0xff] %vm569_vm3, %v556_v31  ;;  %581 = vst.msk [vmem:[%s975_s29 + $0x58] sm:$0xff] %vm569_vm3, %v564_v32 }
 0x112   : > { %v476_v33 = vpop.f32.mrb[8].mxu0  ;;  %v508_v34 = vpop.f32.mrb[8].mxu1 }
 0x113   : > { %v534_v35 = vmul.f32 %v962_v63, %v476_v33  ;;  %v542_v36 = vmul.f32 %v962_v63, %v508_v34  ;;  %v478_v37 = vpop.f32.mrb[9].mxu0  ;;  %v510_v38 = vpop.f32.mrb[9].mxu1 }
 0x114   : > { %v479_v39 = vpop.f32.mrb[10].mxu0  ;;  %v511_v40 = vpop.f32.mrb[10].mxu1 }
 0x115   : > { %v557_v41 = vadd.f32 %v968_v1, %v534_v35  ;;  %v565_v42 = vadd.f32 %v968_v1, %v542_v36  ;;  %v535_v43 = vmul.f32 %v962_v63, %v479_v39  ;;  %v543_v44 = vmul.f32 %v962_v63, %v511_v40  ;;  %v481_v45 = vpop.f32.mrb[11].mxu0  ;;  %v513_v46 = vpop.f32.mrb[11].mxu1 }
 0x117   : > { %574 = vst.msk [vmem:[%s975_s29 + $0x20] sm:$0xff] %vm569_vm3, %v557_v41  ;;  %582 = vst.msk [vmem:[%s975_s29 + $0x60] sm:$0xff] %vm569_vm3, %v565_v42  ;;  %v558_v47 = vadd.f32 %v968_v1, %v535_v43  ;;  %v566_v48 = vadd.f32 %v968_v1, %v543_v44 }
 0x119   : > { %575 = vst.msk [vmem:[%s975_s29 + $0x28] sm:$0xff] %vm569_vm3, %v558_v47  ;;  %583 = vst.msk [vmem:[%s975_s29 + $0x68] sm:$0xff] %vm569_vm3, %v566_v48 }
 0x11a   : > { %v484_v49 = vpop.f32.mrb[12].mxu0  ;;  %v516_v50 = vpop.f32.mrb[12].mxu1 }
 0x11b   : > { %v536_v51 = vmul.f32 %v962_v63, %v484_v49  ;;  %v544_v52 = vmul.f32 %v962_v63, %v516_v50  ;;  %v486_v53 = vpop.f32.mrb[13].mxu0  ;;  %v518_v54 = vpop.f32.mrb[13].mxu1 }
 0x11c   : > { %v487_v55 = vpop.f32.mrb[14].mxu0  ;;  %v519_v56 = vpop.f32.mrb[14].mxu1 }
 0x11d   : > { %v559_v57 = vadd.f32 %v968_v1, %v536_v51  ;;  %v567_v58 = vadd.f32 %v968_v1, %v544_v52  ;;  %v537_v59 = vmul.f32 %v962_v63, %v487_v55  ;;  %v545_v60 = vmul.f32 %v962_v63, %v519_v56  ;;  %v489_v61 = vpop.f32.mrb[15].mxu0  ;;  %v521_v62 = vpop.f32.mrb[15].mxu1 }
 0x11f   : > { %576 = vst.msk [vmem:[%s975_s29 + $0x30] sm:$0xff] %vm569_vm3, %v559_v57  ;;  %584 = vst.msk [vmem:[%s975_s29 + $0x70] sm:$0xff] %vm569_vm3, %v567_v58  ;;  %v560_v0 = vadd.f32 %v968_v1, %v537_v59  ;;  %v568_v2 = vadd.f32 %v968_v1, %v545_v60 }
 0x121   : > { %577 = vst.msk [vmem:[%s975_s29 + $0x38] sm:$0xff] %vm569_vm3, %v560_v0  ;;  %585 = vst.msk [vmem:[%s975_s29 + $0x78] sm:$0xff] %vm569_vm3, %v568_v2 }
 0x122 PF: > { %s14_s17 = sadd.s32 1, %s814_s17   ;;  %s1053_s15 = smov %s810_s16 }
 0x123   : > { %p11_p5 = scmp.ge.s32.totalorder %s14_s17, 14   ;;  %s1054_s16 = smov %s1056_s18 }
 0x125   :  { %13 = sbr.rel (!%p11_p5) target bundleno = 2 (0x2), region = 75 }

</bundles_post_ra>
